<compile_context>
chip_gen: v7x
topology: tpu7x:2x2x1
jax: 0.10.0
libtpu: 0.0.40
codegen_flags: <defaults>
</compile_context>

<pallas_src>
import functools

import jax
import jax.numpy as jnp
from jax.experimental import pallas as pl
from jax.experimental.pallas import tpu as pltpu

LANE = 128
DEFAULT_TILE = 1024   # review sweet spot 1024-2048; amortizes ~0.35 us/grid-step overhead


def _round_up(v, m):
    return -(-v // m) * m


# ---------------------------------------------------------------------------
# Fused two-layer GCN kernel.
#   grid = (phase, row_tile_i, reduction_tile_k); phase 0 = layer 1, phase 1 = layer 2.
#   Inputs: A_hat tiles (bf16, streamed), Z1 = X@W1 (bf16, resident), W2 (bf16), b1, b2.
#   Scratch: h (bf16, resident, never hits HBM), per-row-tile f32 accumulator.
# ---------------------------------------------------------------------------
def _fused_gcn_kernel(a_ref, z1_ref, w2_ref, b1_ref, b2_ref, o_ref,
                      h_ref, acc_ref, *, tile):
    phase = pl.program_id(0)
    i = pl.program_id(1)
    k = pl.program_id(2)
    nk = pl.num_programs(2)
    kk = pl.multiple_of(k * tile, tile)

    # -- accumulator init at the start of each row tile's reduction --
    @pl.when(k == 0)
    def _():
        acc_ref[...] = jnp.zeros_like(acc_ref)

    # -- phase-1 feature transform, tiled over k and done once (at i == 0), in place:
    #    h[kk:kk+t] <- h[kk:kk+t] @ W2.  No big prologue bubble, no extra Z scratch. --
    @pl.when((phase == 1) & (i == 0))
    def _():
        h_ref[pl.ds(kk, tile), :] = jnp.dot(
            h_ref[pl.ds(kk, tile), :], w2_ref[...],
            preferred_element_type=jnp.float32,
        ).astype(jnp.bfloat16)

    # -- streamed aggregation: acc += A_hat[i, k] @ Z[k]  (bf16 MXU, f32 accumulate) --
    @pl.when(phase == 0)
    def _():
        acc_ref[...] += jnp.dot(
            a_ref[...], z1_ref[pl.ds(kk, tile), :], preferred_element_type=jnp.float32
        )

    @pl.when(phase == 1)
    def _():
        acc_ref[...] += jnp.dot(
            a_ref[...], h_ref[pl.ds(kk, tile), :], preferred_element_type=jnp.float32
        )

    # -- finalize the row tile at the end of the reduction --
    last_k = k == nk - 1

    @pl.when(last_k & (phase == 0))
    def _():
        row = pl.multiple_of(i * tile, tile)
        h_ref[pl.ds(row, tile), :] = jnp.maximum(
            acc_ref[...] + b1_ref[...], 0.0
        ).astype(jnp.bfloat16)                         # relu(A Z1 + b1), stays in VMEM
        # NOTE: no o_ref write in phase 0 — the output block is pinned at (0, 0) by the
        # out index_map, so layer 1 produces zero output HBM writeback.

    @pl.when(last_k & (phase == 1))
    def _():
        o_ref[...] = acc_ref[...] + b2_ref[...]        # A (h W2) + b2


# ---------------------------------------------------------------------------
# Wrapper: padding, BlockSpecs, VMEM budgeting.
# ---------------------------------------------------------------------------
@functools.partial(jax.jit, static_argnames=("tile",))
def gcn_forward(params, x, a_hat, *, tile=DEFAULT_TILE):
    """Eval-mode forward. a_hat: (N, N) normalized adjacency (built once, reused)."""
    assert tile % LANE == 0
    n, _ = x.shape
    hidden = params["w1"].shape[1]
    out_c = params["w2"].shape[1]

    # Lane-dense padded feature width; hidden and out share one 128-multiple slab.
    feat = max(_round_up(hidden, LANE), _round_up(out_c, LANE))

    # Node dimension padded to a multiple of the (square) A tile.
    t = min(tile, _round_up(n, LANE))
    n_p = _round_up(n, t)

    # Layer-1 feature transform hoisted to plain XLA (review item): removes the
    # in-kernel prologue bubble and the biggest N-scaling VMEM resident (X).
    z1 = jnp.dot(x, params["w1"], preferred_element_type=jnp.float32)

    # Zero padding is exactly neutral: padded A rows/cols are 0 and padded weight/bias
    # columns are 0, so padded outputs are dropped by the final slice.
    a_p = jnp.pad(a_hat.astype(jnp.bfloat16), ((0, n_p - n), (0, n_p - n)))
    z1_p = jnp.pad(z1, ((0, n_p - n), (0, feat - hidden))).astype(jnp.bfloat16)
    w2_p = jnp.pad(params["w2"], ((0, feat - hidden), (0, feat - out_c))).astype(jnp.bfloat16)
    b1_p = jnp.pad(params["b1"], ((0, feat - hidden),)).reshape(1, feat)
    b2_p = jnp.pad(params["b2"], ((0, feat - out_c),)).reshape(1, feat)

    grid = (2, n_p // t, n_p // t)          # (layer phase, row tiles, reduction tiles)

    a_spec = pl.BlockSpec((t, t), lambda p, i, k: (i, k))
    res = lambda shape: pl.BlockSpec(shape, lambda p, i, k: (0, 0))   # fully resident
    # Output pinned at block (0, 0) during phase 0 (never written there, never flushed);
    # phase 1 walks row tiles normally and writes each block exactly once.
    out_spec = pl.BlockSpec((t, feat), lambda p, i, k: (i * p, 0))

    scratch = [
        pltpu.VMEM((n_p, feat), jnp.bfloat16),   # h: layer-1 activations, transformed
                                                 #    in place to h@W2 during phase 1
        pltpu.VMEM((t, feat), jnp.float32),      # per-row-tile f32 accumulator
    ]

    # Working-set estimate for the scoped-VMEM limit (streamed operands double-buffered).
    vmem_bytes = (
        2 * t * t * 2                                     # A tiles (bf16, double-buffered)
        + 2 * t * feat * 4                                # output tile (f32, double-buffered)
        + 2 * (n_p * feat * 2 + feat * feat * 2 + 2 * feat * 4)   # resident inputs
        + n_p * feat * 2 + t * feat * 4                   # scratch (h bf16, acc f32)
    )
    vmem_limit = int(max(vmem_bytes + (4 << 20), 32 << 20))

    out_p = pl.pallas_call(
        functools.partial(_fused_gcn_kernel, tile=t),
        out_shape=jax.ShapeDtypeStruct((n_p, feat), jnp.float32),
        grid_spec=pltpu.PrefetchScalarGridSpec(
            num_scalar_prefetch=0,
            grid=grid,
            in_specs=[
                a_spec,                 # A_hat, streamed bf16 tiles
                res((n_p, feat)),       # Z1 = X @ W1 (bf16, resident)
                res((feat, feat)),      # W2 (bf16, lane-padded)
                res((1, feat)),         # b1
                res((1, feat)),         # b2
            ],
            out_specs=out_spec,
            scratch_shapes=scratch,
        ),
        compiler_params=pltpu.CompilerParams(
            # Row axis cannot be megacore-"parallel": layer 2 reads the whole per-core
            # h scratch produced in phase 0 (see v7x TODO in the header).
            dimension_semantics=("arbitrary", "arbitrary", "arbitrary"),
            vmem_limit_bytes=vmem_limit,
        ),
    )(a_p, z1_p, w2_p, b1_p, b2_p)

    return out_p[:n, :out_c]


# ---------------------------------------------------------------------------
# JAX glue: dense symmetrically-normalized adjacency, built once and reused.
# ---------------------------------------------------------------------------
def build_norm_adj(edge_index, num_nodes):
    src, dst = edge_index[0], edge_index[1]
    loop = jnp.arange(num_nodes, dtype=edge_index.dtype)
    src = jnp.concatenate([src, loop])
    dst = jnp.concatenate([dst, loop])
    deg = jnp.zeros((num_nodes,), jnp.float32).at[dst].add(1.0)
    d_inv_sqrt = jnp.where(deg > 0.0, jax.lax.rsqrt(deg), 0.0)
    norm = d_inv_sqrt[src] * d_inv_sqrt[dst]
    # out[dst] += norm * x[src]   <=>   A_hat[dst, src] = norm
    a = jnp.zeros((num_nodes, num_nodes), jnp.float32).at[dst, src].add(norm)
    return a


# ---------------------------------------------------------------------------
# Parameter init (Glorot, matching PyG GCNConv defaults with bias).
# ---------------------------------------------------------------------------
def glorot(key, fan_in, fan_out):
    limit = jnp.sqrt(6.0 / (fan_in + fan_out))
    return jax.random.uniform(key, (fan_in, fan_out), jnp.float32, -limit, limit)


def init_gcn_params(key, in_channels, hidden_channels, out_channels):
    k1, k2 = jax.random.split(key)
    return {
        "w1": glorot(k1, in_channels, hidden_channels),
        "b1": jnp.zeros((hidden_channels,), jnp.float32),
        "w2": glorot(k2, hidden_channels, out_channels),
        "b2": jnp.zeros((out_channels,), jnp.float32),
    }


# ---------------------------------------------------------------------------
if __name__ == "__main__":
    key = jax.random.PRNGKey(0)
    k_x, k_e, k_p = jax.random.split(key, 3)

    num_nodes = 64
    num_edges = 256
    in_channels, hidden_channels, out_channels = 32, 32, 16

    x = jax.random.normal(k_x, (num_nodes, in_channels), jnp.float32)
    edge_index = jax.random.randint(k_e, (2, num_edges), 0, num_nodes, jnp.int32)
    params = init_gcn_params(k_p, in_channels, hidden_channels, out_channels)

    # Adjacency normalization is built once and reused across forward calls.
    a_hat = build_norm_adj(edge_index, num_nodes)

    out = gcn_forward(params, x, a_hat)
    jax.block_until_ready(out)
    assert out.shape == (num_nodes, out_channels)
    print("KERNEL_OK")
</pallas_src>

<mosaic_0001>
module attributes {stable_mosaic.version = 11 : i64} {
  func.func @_fused_gcn_kernel(%arg0: i32, %arg1: i32, %arg2: i32, %arg3: memref<128x128xbf16, #tpu.memory_space<vmem>>, %arg4: memref<128x128xbf16, #tpu.memory_space<vmem>>, %arg5: memref<128x128xbf16, #tpu.memory_space<vmem>>, %arg6: memref<1x128xf32, #tpu.memory_space<vmem>>, %arg7: memref<1x128xf32, #tpu.memory_space<vmem>>, %arg8: memref<128x128xf32, #tpu.memory_space<vmem>>, %arg9: memref<128x128xbf16, #tpu.memory_space<vmem>>, %arg10: memref<128x128xf32, #tpu.memory_space<vmem>>) attributes {dimension_semantics = [#tpu.dimension_semantics<arbitrary>, #tpu.dimension_semantics<arbitrary>, #tpu.dimension_semantics<arbitrary>], iteration_bounds = array<i64: 2, 1, 1>, scalar_prefetch = 0 : i64, scratch_operands = 2 : i64, tpu.core_type = #tpu.core_type<tc>, window_params = [{transform_indices = @transform_0, window_bounds = array<i64: 128, 128>}, {pipeline_mode = #tpu.pipeline_mode<synchronous>, transform_indices = @transform_1, window_bounds = array<i64: 128, 128>}, {pipeline_mode = #tpu.pipeline_mode<synchronous>, transform_indices = @transform_2, window_bounds = array<i64: 128, 128>}, {pipeline_mode = #tpu.pipeline_mode<synchronous>, transform_indices = @transform_3, window_bounds = array<i64: 1, 128>}, {pipeline_mode = #tpu.pipeline_mode<synchronous>, transform_indices = @transform_4, window_bounds = array<i64: 1, 128>}, {transform_indices = @transform_5, window_bounds = array<i64: 128, 128>}]} {
    %c128_i32 = arith.constant 128 : i32
    %0 = arith.muli %arg2, %c128_i32 : i32
    %1 = tpu.assume_multiple %0, 128 : i32
    %c0_i32 = arith.constant 0 : i32
    %2 = arith.cmpi eq, %arg2, %c0_i32 : i32
    %3 = arith.extui %2 : i1 to i32
    %c0_i32_0 = arith.constant 0 : i32
    %4 = arith.cmpi ne, %3, %c0_i32_0 : i32
    scf.if %4 {
      %cst = arith.constant 0.000000e+00 : f32
      %25 = vector.broadcast %cst : f32 to vector<128x128xf32>
      %c0 = arith.constant 0 : index
      %c0_12 = arith.constant 0 : index
      %26 = vector.load %arg10[%c0, %c0_12] : memref<128x128xf32, #tpu.memory_space<vmem>>, vector<128x128xf32>
      tpu.vector_store %arg10[%c0, %c0_12], %25 {strides = array<i32>} : memref<128x128xf32, #tpu.memory_space<vmem>>, vector<128x128xf32>,
    } else {
    }
    %c1_i32 = arith.constant 1 : i32
    %5 = arith.cmpi eq, %arg0, %c1_i32 : i32
    %c0_i32_1 = arith.constant 0 : i32
    %6 = arith.cmpi eq, %arg1, %c0_i32_1 : i32
    %7 = arith.andi %5, %6 : i1
    %8 = arith.extui %7 : i1 to i32
    %c0_i32_2 = arith.constant 0 : i32
    %9 = arith.cmpi ne, %8, %c0_i32_2 : i32
    scf.if %9 {
      %25 = arith.index_cast %1 : i32 to index
      %c0 = arith.constant 0 : index
      %26 = vector.load %arg9[%25, %c0] : memref<128x128xbf16, #tpu.memory_space<vmem>>, vector<128x128xbf16>
      %c0_12 = arith.constant 0 : index
      %c0_13 = arith.constant 0 : index
      %27 = vector.load %arg5[%c0_12, %c0_13] : memref<128x128xbf16, #tpu.memory_space<vmem>>, vector<128x128xbf16>
      %cst = arith.constant dense<0.000000e+00> : vector<128x128xf32>
      %28 = tpu.matmul %26, %27, %cst {dimension_numbers = #tpu.dot_dimension_numbers<[1], [0], [0], [1], [0, 0, 1, 1], [], []>} : vector<128x128xbf16>, vector<128x128xbf16>, vector<128x128xf32> -> vector<128x128xf32>
      %29 = arith.truncf %28 : vector<128x128xf32> to vector<128x128xbf16>
      %30 = arith.index_cast %1 : i32 to index
      %c0_14 = arith.constant 0 : index
      %31 = vector.load %arg9[%30, %c0_14] : memref<128x128xbf16, #tpu.memory_space<vmem>>, vector<128x128xbf16>
      tpu.vector_store %arg9[%30, %c0_14], %29 {strides = array<i32>} : memref<128x128xbf16, #tpu.memory_space<vmem>>, vector<128x128xbf16>,
    } else {
    }
    %c0_i32_3 = arith.constant 0 : i32
    %10 = arith.cmpi eq, %arg0, %c0_i32_3 : i32
    %11 = arith.extui %10 : i1 to i32
    %c0_i32_4 = arith.constant 0 : i32
    %12 = arith.cmpi ne, %11, %c0_i32_4 : i32
    scf.if %12 {
      %c0 = arith.constant 0 : index
      %c0_12 = arith.constant 0 : index
      %25 = vector.load %arg10[%c0, %c0_12] : memref<128x128xf32, #tpu.memory_space<vmem>>, vector<128x128xf32>
      %c0_13 = arith.constant 0 : index
      %c0_14 = arith.constant 0 : index
      %26 = vector.load %arg3[%c0_13, %c0_14] : memref<128x128xbf16, #tpu.memory_space<vmem>>, vector<128x128xbf16>
      %27 = arith.index_cast %1 : i32 to index
      %c0_15 = arith.constant 0 : index
      %28 = vector.load %arg4[%27, %c0_15] : memref<128x128xbf16, #tpu.memory_space<vmem>>, vector<128x128xbf16>
      %cst = arith.constant dense<0.000000e+00> : vector<128x128xf32>
      %29 = tpu.matmul %26, %28, %cst {dimension_numbers = #tpu.dot_dimension_numbers<[1], [0], [0], [1], [0, 0, 1, 1], [], []>} : vector<128x128xbf16>, vector<128x128xbf16>, vector<128x128xf32> -> vector<128x128xf32>
      %30 = arith.addf %25, %29 : vector<128x128xf32>
      %c0_16 = arith.constant 0 : index
      %c0_17 = arith.constant 0 : index
      %31 = vector.load %arg10[%c0_16, %c0_17] : memref<128x128xf32, #tpu.memory_space<vmem>>, vector<128x128xf32>
      tpu.vector_store %arg10[%c0_16, %c0_17], %30 {strides = array<i32>} : memref<128x128xf32, #tpu.memory_space<vmem>>, vector<128x128xf32>,
    } else {
    }
    %c1_i32_5 = arith.constant 1 : i32
    %13 = arith.cmpi eq, %arg0, %c1_i32_5 : i32
    %14 = arith.extui %13 : i1 to i32
    %c0_i32_6 = arith.constant 0 : i32
    %15 = arith.cmpi ne, %14, %c0_i32_6 : i32
    scf.if %15 {
      %c0 = arith.constant 0 : index
      %c0_12 = arith.constant 0 : index
      %25 = vector.load %arg10[%c0, %c0_12] : memref<128x128xf32, #tpu.memory_space<vmem>>, vector<128x128xf32>
      %c0_13 = arith.constant 0 : index
      %c0_14 = arith.constant 0 : index
      %26 = vector.load %arg3[%c0_13, %c0_14] : memref<128x128xbf16, #tpu.memory_space<vmem>>, vector<128x128xbf16>
      %27 = arith.index_cast %1 : i32 to index
      %c0_15 = arith.constant 0 : index
      %28 = vector.load %arg9[%27, %c0_15] : memref<128x128xbf16, #tpu.memory_space<vmem>>, vector<128x128xbf16>
      %cst = arith.constant dense<0.000000e+00> : vector<128x128xf32>
      %29 = tpu.matmul %26, %28, %cst {dimension_numbers = #tpu.dot_dimension_numbers<[1], [0], [0], [1], [0, 0, 1, 1], [], []>} : vector<128x128xbf16>, vector<128x128xbf16>, vector<128x128xf32> -> vector<128x128xf32>
      %30 = arith.addf %25, %29 : vector<128x128xf32>
      %c0_16 = arith.constant 0 : index
      %c0_17 = arith.constant 0 : index
      %31 = vector.load %arg10[%c0_16, %c0_17] : memref<128x128xf32, #tpu.memory_space<vmem>>, vector<128x128xf32>
      tpu.vector_store %arg10[%c0_16, %c0_17], %30 {strides = array<i32>} : memref<128x128xf32, #tpu.memory_space<vmem>>, vector<128x128xf32>,
    } else {
    }
    %c0_i32_7 = arith.constant 0 : i32
    %16 = arith.cmpi eq, %arg2, %c0_i32_7 : i32
    %c0_i32_8 = arith.constant 0 : i32
    %17 = arith.cmpi eq, %arg0, %c0_i32_8 : i32
    %18 = arith.andi %16, %17 : i1
    %19 = arith.extui %18 : i1 to i32
    %c0_i32_9 = arith.constant 0 : i32
    %20 = arith.cmpi ne, %19, %c0_i32_9 : i32
    scf.if %20 {
      %c128_i32_12 = arith.constant 128 : i32
      %25 = arith.muli %arg1, %c128_i32_12 : i32
      %26 = tpu.assume_multiple %25, 128 : i32
      %c0 = arith.constant 0 : index
      %c0_13 = arith.constant 0 : index
      %27 = vector.load %arg10[%c0, %c0_13] : memref<128x128xf32, #tpu.memory_space<vmem>>, vector<128x128xf32>
      %c0_14 = arith.constant 0 : index
      %c0_15 = arith.constant 0 : index
      %28 = vector.load %arg6[%c0_14, %c0_15] : memref<1x128xf32, #tpu.memory_space<vmem>>, vector<1x128xf32>
      %29 = vector.broadcast %28 : vector<1x128xf32> to vector<128x128xf32>
      %30 = arith.addf %27, %29 : vector<128x128xf32>
      %cst = arith.constant 0.000000e+00 : f32
      %31 = vector.broadcast %cst : f32 to vector<128x128xf32>
      %32 = arith.maximumf %30, %31 : vector<128x128xf32>
      %33 = arith.truncf %32 : vector<128x128xf32> to vector<128x128xbf16>
      %34 = arith.index_cast %26 : i32 to index
      %c0_16 = arith.constant 0 : index
      %35 = vector.load %arg9[%34, %c0_16] : memref<128x128xbf16, #tpu.memory_space<vmem>>, vector<128x128xbf16>
      tpu.vector_store %arg9[%34, %c0_16], %33 {strides = array<i32>} : memref<128x128xbf16, #tpu.memory_space<vmem>>, vector<128x128xbf16>,
    } else {
    }
    %c1_i32_10 = arith.constant 1 : i32
    %21 = arith.cmpi eq, %arg0, %c1_i32_10 : i32
    %22 = arith.andi %16, %21 : i1
    %23 = arith.extui %22 : i1 to i32
    %c0_i32_11 = arith.constant 0 : i32
    %24 = arith.cmpi ne, %23, %c0_i32_11 : i32
    scf.if %24 {
      %c0 = arith.constant 0 : index
      %c0_12 = arith.constant 0 : index
      %25 = vector.load %arg10[%c0, %c0_12] : memref<128x128xf32, #tpu.memory_space<vmem>>, vector<128x128xf32>
      %c0_13 = arith.constant 0 : index
      %c0_14 = arith.constant 0 : index
      %26 = vector.load %arg7[%c0_13, %c0_14] : memref<1x128xf32, #tpu.memory_space<vmem>>, vector<1x128xf32>
      %27 = vector.broadcast %26 : vector<1x128xf32> to vector<128x128xf32>
      %28 = arith.addf %25, %27 : vector<128x128xf32>
      %c0_15 = arith.constant 0 : index
      %c0_16 = arith.constant 0 : index
      %29 = vector.load %arg8[%c0_15, %c0_16] : memref<128x128xf32, #tpu.memory_space<vmem>>, vector<128x128xf32>
      tpu.vector_store %arg8[%c0_15, %c0_16], %28 {strides = array<i32>} : memref<128x128xf32, #tpu.memory_space<vmem>>, vector<128x128xf32>,
    } else {
    }
    return
  }
  func.func @transform_0(%arg0: i32, %arg1: i32, %arg2: i32) -> (i32, i32) {
    %c0_i32 = arith.constant 0 : i32
    return %arg1, %arg2 : i32, i32
  }
  func.func @transform_1(%arg0: i32, %arg1: i32, %arg2: i32) -> (i32, i32) {
    %c0_i32 = arith.constant 0 : i32
    %c0_i32_0 = arith.constant 0 : i32
    %c0_i32_1 = arith.constant 0 : i32
    return %c0_i32, %c0_i32_0 : i32, i32
  }
  func.func @transform_2(%arg0: i32, %arg1: i32, %arg2: i32) -> (i32, i32) {
    %c0_i32 = arith.constant 0 : i32
    %c0_i32_0 = arith.constant 0 : i32
    %c0_i32_1 = arith.constant 0 : i32
    return %c0_i32, %c0_i32_0 : i32, i32
  }
  func.func @transform_3(%arg0: i32, %arg1: i32, %arg2: i32) -> (i32, i32) {
    %c0_i32 = arith.constant 0 : i32
    %c0_i32_0 = arith.constant 0 : i32
    %c0_i32_1 = arith.constant 0 : i32
    return %c0_i32, %c0_i32_0 : i32, i32
  }
  func.func @transform_4(%arg0: i32, %arg1: i32, %arg2: i32) -> (i32, i32) {
    %c0_i32 = arith.constant 0 : i32
    %c0_i32_0 = arith.constant 0 : i32
    %c0_i32_1 = arith.constant 0 : i32
    return %c0_i32, %c0_i32_0 : i32, i32
  }
  func.func @transform_5(%arg0: i32, %arg1: i32, %arg2: i32) -> (i32, i32) {
    %0 = arith.muli %arg1, %arg0 : i32
    %c0_i32 = arith.constant 0 : i32
    %c0_i32_0 = arith.constant 0 : i32
    return %0, %c0_i32 : i32, i32
  }
}

</mosaic_0001>

<bundles_post_ra>
// kernel: gcn_forward.1
= control target key start
LH: loop header
LB: loop body
LE: loop exit
PB: predicated region body
PF: predicated region fallthrough
CT: control target
= control target key end

     0   :  { %s1564_s18 = smov 0   ;;  %s1566_s19 = smov 0   ;;  %s1753_s0 = inlined_call_operand.vmem [shape: bf16[128,128], index: 0, kind: input, shape index: {}]   ;;  %s1754_s1 = inlined_call_operand.vmem [shape: bf16[128,128], index: 1, kind: input, shape index: {}]   ;;  %s1755_s2 = inlined_call_operand.vmem [shape: bf16[128,128], index: 2, kind: input, shape index: {}]   ;;  %s1756_s3 = inlined_call_operand.vmem [shape: f32[1,128], index: 3, kind: input, shape index: {}]   ;;  %s1757_s4 = inlined_call_operand.vmem [shape: f32[1,128], index: 4, kind: input, shape index: {}]   ;;  %s1758_s5 = inlined_call_operand.vmem [shape: f32[128,128], index: 5, kind: output, shape index: {}]  }
   0x1   :  { %s1568_s20 = smov 0  }
   0x2 LB: > { %s34_s21 = sadd.s32 1, %s1527_s19  ;;  %p1213_p0 = scmp.ge.s32.totalorder %s1531_s20, 1  ;;  %s1531_s20 = sphi %s1568_s20, %s15_s20   ;;  %s1527_s19 = sphi %s1566_s19, %s1760_s19   ;;  %s1523_s18 = sphi %s1564_s18, %s1759_s18  }
   0x3   : > { %p36_p1 = scmp.ge.s32.totalorder %s34_s21, 2  ;;  %p214_p2 = scmp.lt.s32.totalorder %s1531_s20, 3 }
   0x5   : > { %s1762_s21 = smov (%p36_p1, %s34_s21), 0  ;;  %p215_p3 = pnand %p1213_p0, %p214_p2 }
   0x6   : > { %p285_p4 = scmp.eq.s32.totalorder (!%p215_p3), %s1523_s18, 1  ;;  %v1533_v0 = vmov (!%p215_p3), 0.0  }
   0x7   : > { %218 = sbr.rel (%p215_p3) target bundleno = 820 (0x334), region = 40  ;;  %269 = vst [vmem:[#allocation3] sm:$0xff] (!%p215_p3), %v1533_v0  ;;  %270 = vst [vmem:[#allocation3 + $0x8] sm:$0xff] (!%p215_p3), %v1533_v0 }
   0x8   : > { %271 = vst [vmem:[#allocation3 + $0x10] sm:$0xff] (!%p215_p3), %v1533_v0  ;;  %272 = vst [vmem:[#allocation3 + $0x18] sm:$0xff] (!%p215_p3), %v1533_v0 }
   0x9   : > { %273 = vst [vmem:[#allocation3 + $0x20] sm:$0xff] (!%p215_p3), %v1533_v0  ;;  %274 = vst [vmem:[#allocation3 + $0x28] sm:$0xff] (!%p215_p3), %v1533_v0 }
   0xa   : > { %275 = vst [vmem:[#allocation3 + $0x30] sm:$0xff] (!%p215_p3), %v1533_v0  ;;  %276 = vst [vmem:[#allocation3 + $0x38] sm:$0xff] (!%p215_p3), %v1533_v0 }
   0xb   : > { %277 = vst [vmem:[#allocation3 + $0x40] sm:$0xff] (!%p215_p3), %v1533_v0  ;;  %278 = vst [vmem:[#allocation3 + $0x48] sm:$0xff] (!%p215_p3), %v1533_v0 }
   0xc   : > { %279 = vst [vmem:[#allocation3 + $0x50] sm:$0xff] (!%p215_p3), %v1533_v0  ;;  %280 = vst [vmem:[#allocation3 + $0x58] sm:$0xff] (!%p215_p3), %v1533_v0 }
   0xd   : > { %281 = vst [vmem:[#allocation3 + $0x60] sm:$0xff] (!%p215_p3), %v1533_v0  ;;  %282 = vst [vmem:[#allocation3 + $0x68] sm:$0xff] (!%p215_p3), %v1533_v0 }
   0xe   : > { %283 = vst [vmem:[#allocation3 + $0x70] sm:$0xff] %v1533_v0  ;;  %284 = vst [vmem:[#allocation3 + $0x78] sm:$0xff] %v1533_v0  ;;  %290 = sbr.rel (!%p285_p4) target bundleno = 273 (0x111), region = 48  ;;  %v1477_v1 = vld [vmem:[%s1755_s2] sm:$0xff] (%p285_p4)   ;;  %v1478_v2 = vld [vmem:[%s1755_s2 + $0x8] sm:$0xff] (%p285_p4)  }
   0xf   : > { %1308 = vmatprep.subr.bf16.mxu0 (%p285_p4), %v1477_v1  ;;  %1404 = vmatprep.subr.bf16.mxu1 (%p285_p4), %v1477_v1  ;;  %v1479_v3 = vld [vmem:[%s1755_s2 + $0x10] sm:$0xff] (%p285_p4)   ;;  %v1480_v4 = vld [vmem:[%s1755_s2 + $0x18] sm:$0xff] (%p285_p4)   ;;  %v1481_v7 = vld [vmem:[%s1755_s2 + $0x20] sm:$0xff] (%p285_p4)  }
  0x10   : > { %1309 = vmatpush3.bf16.msra.mxu0 (%p285_p4), %v1477_v1  ;;  %1412 = vmatpush3.bf16.msra.mxu1 (%p285_p4), %v1477_v1  ;;  %v295_v5 = vld [vmem:[#allocation2] sm:$0xff] (%p285_p4)  ;;  %v1482_v8 = vld [vmem:[%s1755_s2 + $0x28] sm:$0xff] (%p285_p4)   ;;  %v1484_v10 = vld [vmem:[%s1755_s2 + $0x38] sm:$0xff] (%p285_p4)  }
  0x11   : > { %1310 = vmatprep.subr.bf16.mxu0 (%p285_p4), %v1478_v2  ;;  %1405 = vmatprep.subr.bf16.mxu1 (%p285_p4), %v1478_v2  ;;  %v299_v6 = vld [vmem:[#allocation2 + $0x20] sm:$0xff] (%p285_p4)  ;;  %v296_v11 = vld [vmem:[#allocation2 + $0x8] sm:$0xff] (%p285_p4)  ;;  %v297_v13 = vld [vmem:[#allocation2 + $0x10] sm:$0xff] (%p285_p4) }
  0x12   : > { %1324 = vmatprep.mubr.bf16.mxu0 (%p285_p4), %v295_v5  ;;  %1332 = vmatprep.mubr.bf16.mxu1 (%p285_p4), %v299_v6  ;;  %v1483_v9 = vld [vmem:[%s1755_s2 + $0x30] sm:$0xff] (%p285_p4)   ;;  %v300_v12 = vld [vmem:[#allocation2 + $0x28] sm:$0xff] (%p285_p4)  ;;  %v301_v14 = vld [vmem:[#allocation2 + $0x30] sm:$0xff] (%p285_p4) }
  0x13   : > { %v298_v15 = vld [vmem:[#allocation2 + $0x18] sm:$0xff] (%p285_p4) }
  0x14   : > { %1311 = vmatpush3.bf16.msra.mxu0 (%p285_p4), %v1478_v2  ;;  %1413 = vmatpush3.bf16.msra.mxu1 (%p285_p4), %v1478_v2  ;;  %v302_v16 = vld [vmem:[#allocation2 + $0x38] sm:$0xff] (%p285_p4) }
  0x15   : > { %1312 = vmatprep.subr.bf16.mxu0 %v1479_v3  ;;  %1406 = vmatprep.subr.bf16.mxu1 %v1479_v3 }
  0x18   : > { %1313 = vmatpush3.bf16.msra.mxu0 %v1479_v3  ;;  %1414 = vmatpush3.bf16.msra.mxu1 %v1479_v3 }
  0x19   : > { %1314 = vmatprep.subr.bf16.mxu0 %v1480_v4  ;;  %1407 = vmatprep.subr.bf16.mxu1 %v1480_v4 }
  0x1c   : > { %1315 = vmatpush3.bf16.msra.mxu0 %v1480_v4  ;;  %1415 = vmatpush3.bf16.msra.mxu1 %v1480_v4 }
  0x1d   : > { %1316 = vmatprep.subr.bf16.mxu0 %v1481_v7  ;;  %1408 = vmatprep.subr.bf16.mxu1 %v1481_v7 }
  0x20   : > { %1317 = vmatpush3.bf16.msra.mxu0 %v1481_v7  ;;  %1416 = vmatpush3.bf16.msra.mxu1 %v1481_v7 }
  0x21   : > { %1318 = vmatprep.subr.bf16.mxu0 %v1482_v8  ;;  %1409 = vmatprep.subr.bf16.mxu1 %v1482_v8 }
  0x24   : > { %1319 = vmatpush3.bf16.msra.mxu0 %v1482_v8  ;;  %1417 = vmatpush3.bf16.msra.mxu1 %v1482_v8 }
  0x25   : > { %1320 = vmatprep.subr.bf16.mxu0 %v1483_v9  ;;  %1410 = vmatprep.subr.bf16.mxu1 %v1483_v9 }
  0x28   : > { %1321 = vmatpush3.bf16.msra.mxu0 %v1483_v9  ;;  %1418 = vmatpush3.bf16.msra.mxu1 %v1483_v9 }
  0x29   : > { %1322 = vmatprep.subr.bf16.mxu0 %v1484_v10  ;;  %1411 = vmatprep.subr.bf16.mxu1 %v1484_v10 }
  0x2c   : > { %1323 = vmatpush3.bf16.msra.mxu0 %v1484_v10  ;;  %1419 = vmatpush3.bf16.msra.mxu1 %v1484_v10 }
  0x2f   : > { %1325 = vmatmul.mubr.bf16.vlgmr.msra.gmra.mrb[0].mxu0 %v296_v11  ;;  %1333 = vmatmul.mubr.bf16.vlgmr.msra.gmra.mrb[0].mxu1 %v300_v12 }
  0x30   : > { %1328 = vmatprep.mubr.bf16.mxu0 %v297_v13  ;;  %1336 = vmatprep.mubr.bf16.mxu1 %v301_v14 }
  0x37   : > { %1329 = vmatmul.mubr.bf16.gmra.mrb[4].mxu0 %v298_v15  ;;  %1337 = vmatmul.mubr.bf16.gmra.mrb[4].mxu1 %v302_v16 }
 0x102   : > { %v1326_v17 = vpop.f32.mrb[0].mxu0  ;;  %v1334_v18 = vpop.f32.mrb[0].mxu1 }
 0x103   : > { %v401_v19 = vpop.f32.mrb[1].mxu0  ;;  %v433_v20 = vpop.f32.mrb[1].mxu1 }
 0x104   : > { %v1327_v21 = vpop.f32.mrb[2].mxu0  ;;  %v1335_v22 = vpop.f32.mrb[2].mxu1 }
 0x105   : > { %v465_v23 = vpack.c.bf16 %v1327_v21, %v1326_v17  ;;  %v469_v24 = vpack.c.bf16 %v1335_v22, %v1334_v18  ;;  %v404_v25 = vpop.f32.mrb[3].mxu0  ;;  %v436_v26 = vpop.f32.mrb[3].mxu1 }
 0x106   : > { %v464_v27 = vpack.c.bf16 %v404_v25, %v401_v19  ;;  %v468_v28 = vpack.c.bf16 %v436_v26, %v433_v20 }
 0x107   : > { %473 = vst [vmem:[#allocation2 + $0x8] sm:$0xff] %v465_v23  ;;  %477 = vst [vmem:[#allocation2 + $0x28] sm:$0xff] %v469_v24 }
 0x108   : > { %472 = vst [vmem:[#allocation2] sm:$0xff] %v464_v27  ;;  %476 = vst [vmem:[#allocation2 + $0x20] sm:$0xff] %v468_v28 }
 0x10a   : > { %v1330_v29 = vpop.f32.mrb[4].mxu0  ;;  %v1338_v30 = vpop.f32.mrb[4].mxu1 }
 0x10b   : > { %v417_v31 = vpop.f32.mrb[5].mxu0  ;;  %v449_v32 = vpop.f32.mrb[5].mxu1 }
 0x10c   : > { %v1331_v33 = vpop.f32.mrb[6].mxu0  ;;  %v1339_v34 = vpop.f32.mrb[6].mxu1 }
 0x10d   : > { %v467_v35 = vpack.c.bf16 %v1331_v33, %v1330_v29  ;;  %v471_v36 = vpack.c.bf16 %v1339_v34, %v1338_v30  ;;  %v420_v37 = vpop.f32.mrb[7].mxu0  ;;  %v452_v38 = vpop.f32.mrb[7].mxu1 }
 0x10e   : > { %v466_v39 = vpack.c.bf16 %v420_v37, %v417_v31  ;;  %v470_v40 = vpack.c.bf16 %v452_v38, %v449_v32 }
 0x10f   : > { %475 = vst [vmem:[#allocation2 + $0x18] sm:$0xff] %v467_v35  ;;  %479 = vst [vmem:[#allocation2 + $0x38] sm:$0xff] %v471_v36 }
 0x110   : > { %474 = vst [vmem:[#allocation2 + $0x10] sm:$0xff] %v466_v39  ;;  %478 = vst [vmem:[#allocation2 + $0x30] sm:$0xff] %v470_v40 }
 0x111 PF: > { %p480_p5 = scmp.eq.s32.totalorder %s1523_s18, 0  ;;  %p1223_p6 = scmp.ne.s32.totalorder %s1523_s18, 0 }
 0x112   : > { %v1485_v41 = vld [vmem:[%s1754_s1] sm:$0xff] (!%p1223_p6)   ;;  %v1486_v42 = vld [vmem:[%s1754_s1 + $0x8] sm:$0xff] (!%p1223_p6)   ;;  %v1487_v43 = vld [vmem:[%s1754_s1 + $0x10] sm:$0xff] (!%p1223_p6)  }
 0x113   : > { %483 = sbr.rel (%p1223_p6) target bundleno = 533 (0x215), region = 52  ;;  %1340 = vmatprep.subr.bf16.mxu0 (!%p1223_p6), %v1485_v41  ;;  %1420 = vmatprep.subr.bf16.mxu1 (!%p1223_p6), %v1485_v41  ;;  %v1488_v44 = vld [vmem:[%s1754_s1 + $0x18] sm:$0xff] (!%p1223_p6)   ;;  %v1493_v45 = vld [vmem:[%s1753_s0] sm:$0xff] (!%p1223_p6)   ;;  %v1490_v48 = vld [vmem:[%s1754_s1 + $0x28] sm:$0xff] (!%p1223_p6)  }
 0x114   : > { %1341 = vmatpush3.bf16.msra.mxu0 (!%p1223_p6), %v1485_v41  ;;  %1428 = vmatpush3.bf16.msra.mxu1 (!%p1223_p6), %v1485_v41  ;;  %v1494_v46 = vld [vmem:[%s1753_s0 + $0x20] sm:$0xff] (!%p1223_p6)   ;;  %v1491_v49 = vld [vmem:[%s1754_s1 + $0x30] sm:$0xff] (!%p1223_p6)   ;;  %v1492_v50 = vld [vmem:[%s1754_s1 + $0x38] sm:$0xff] (!%p1223_p6)  }
 0x115   : > { %1342 = vmatprep.subr.bf16.mxu0 (!%p1223_p6), %v1486_v42  ;;  %1421 = vmatprep.subr.bf16.mxu1 (!%p1223_p6), %v1486_v42  ;;  %v1489_v47 = vld [vmem:[%s1754_s1 + $0x20] sm:$0xff] (!%p1223_p6)   ;;  %v1495_v51 = vld [vmem:[%s1753_s0 + $0x8] sm:$0xff] (!%p1223_p6)   ;;  %v1497_v53 = vld [vmem:[%s1753_s0 + $0x10] sm:$0xff] (!%p1223_p6)  }
 0x116   : > { %1356 = vmatprep.mubr.bf16.mxu0 (!%p1223_p6), %v1493_v45  ;;  %1364 = vmatprep.mubr.bf16.mxu1 (!%p1223_p6), %v1494_v46  ;;  %v1496_v52 = vld [vmem:[%s1753_s0 + $0x28] sm:$0xff] (!%p1223_p6)   ;;  %v1498_v54 = vld [vmem:[%s1753_s0 + $0x30] sm:$0xff] (!%p1223_p6)   ;;  %v1499_v55 = vld [vmem:[%s1753_s0 + $0x18] sm:$0xff] (!%p1223_p6)  }
 0x117   : > { %v1500_v56 = vld [vmem:[%s1753_s0 + $0x38] sm:$0xff] (!%p1223_p6)   ;;  %v486_v57 = vld [vmem:[#allocation3 + $0x10] sm:$0xff] (!%p1223_p6)  ;;  %v484_v59 = vld [vmem:[#allocation3] sm:$0xff] (!%p1223_p6) }
 0x118   : > { %1343 = vmatpush3.bf16.msra.mxu0 (!%p1223_p6), %v1486_v42  ;;  %1429 = vmatpush3.bf16.msra.mxu1 (!%p1223_p6), %v1486_v42  ;;  %v494_v58 = vld [vmem:[#allocation3 + $0x50] sm:$0xff] (!%p1223_p6)  ;;  %v492_v60 = vld [vmem:[#allocation3 + $0x40] sm:$0xff] (!%p1223_p6)  ;;  %v487_v63 = vld [vmem:[#allocation3 + $0x18] sm:$0xff] (!%p1223_p6) }
 0x119   : > { %1344 = vmatprep.subr.bf16.mxu0 (!%p1223_p6), %v1487_v43  ;;  %1422 = vmatprep.subr.bf16.mxu1 (!%p1223_p6), %v1487_v43  ;;  %v495_v0 = vld [vmem:[#allocation3 + $0x58] sm:$0xff] (!%p1223_p6)  ;;  %v485_v5 = vld [vmem:[#allocation3 + $0x8] sm:$0xff] (!%p1223_p6)  ;;  %v490_v17 = vld [vmem:[#allocation3 + $0x30] sm:$0xff] (!%p1223_p6) }
 0x11a   : > { %v493_v6 = vld [vmem:[#allocation3 + $0x48] sm:$0xff]  ;;  %v498_v18 = vld [vmem:[#allocation3 + $0x70] sm:$0xff]  ;;  %v488_v19 = vld [vmem:[#allocation3 + $0x20] sm:$0xff] }
 0x11b   : > { %v496_v20 = vld [vmem:[#allocation3 + $0x60] sm:$0xff]  ;;  %v491_v23 = vld [vmem:[#allocation3 + $0x38] sm:$0xff]  ;;  %v489_v29 = vld [vmem:[#allocation3 + $0x28] sm:$0xff] }
 0x11c   : > { %1345 = vmatpush3.bf16.msra.mxu0 %v1487_v43  ;;  %1430 = vmatpush3.bf16.msra.mxu1 %v1487_v43  ;;  %v499_v24 = vld [vmem:[#allocation3 + $0x78] sm:$0xff]  ;;  %v497_v30 = vld [vmem:[#allocation3 + $0x68] sm:$0xff] }
 0x11d   : > { %1346 = vmatprep.subr.bf16.mxu0 %v1488_v44  ;;  %1423 = vmatprep.subr.bf16.mxu1 %v1488_v44 }
 0x120   : > { %1347 = vmatpush3.bf16.msra.mxu0 %v1488_v44  ;;  %1431 = vmatpush3.bf16.msra.mxu1 %v1488_v44 }
 0x121   : > { %1348 = vmatprep.subr.bf16.mxu0 %v1489_v47  ;;  %1424 = vmatprep.subr.bf16.mxu1 %v1489_v47 }
 0x124   : > { %1349 = vmatpush3.bf16.msra.mxu0 %v1489_v47  ;;  %1432 = vmatpush3.bf16.msra.mxu1 %v1489_v47 }
 0x125   : > { %1350 = vmatprep.subr.bf16.mxu0 %v1490_v48  ;;  %1425 = vmatprep.subr.bf16.mxu1 %v1490_v48 }
 0x128   : > { %1351 = vmatpush3.bf16.msra.mxu0 %v1490_v48  ;;  %1433 = vmatpush3.bf16.msra.mxu1 %v1490_v48 }
 0x129   : > { %1352 = vmatprep.subr.bf16.mxu0 %v1491_v49  ;;  %1426 = vmatprep.subr.bf16.mxu1 %v1491_v49 }
 0x12c   : > { %1353 = vmatpush3.bf16.msra.mxu0 %v1491_v49  ;;  %1434 = vmatpush3.bf16.msra.mxu1 %v1491_v49 }
 0x12d   : > { %1354 = vmatprep.subr.bf16.mxu0 %v1492_v50  ;;  %1427 = vmatprep.subr.bf16.mxu1 %v1492_v50 }
 0x130   : > { %1355 = vmatpush3.bf16.msra.mxu0 %v1492_v50  ;;  %1435 = vmatpush3.bf16.msra.mxu1 %v1492_v50 }
 0x133   : > { %1357 = vmatmul.mubr.bf16.vlgmr.msra.gmra.mrb[0].mxu0 %v1495_v51  ;;  %1365 = vmatmul.mubr.bf16.vlgmr.msra.gmra.mrb[0].mxu1 %v1496_v52 }
 0x134   : > { %1360 = vmatprep.mubr.bf16.mxu0 %v1497_v53  ;;  %1368 = vmatprep.mubr.bf16.mxu1 %v1498_v54 }
 0x13b   : > { %1361 = vmatmul.mubr.bf16.gmra.mrb[4].mxu0 %v1499_v55  ;;  %1369 = vmatmul.mubr.bf16.gmra.mrb[4].mxu1 %v1500_v56 }
 0x206   : > { %v1358_v61 = vpop.f32.mrb[0].mxu0  ;;  %v1366_v62 = vpop.f32.mrb[0].mxu1 }
 0x207   : > { %v731_v1 = vadd.f32 %v1358_v61, %v486_v57  ;;  %v739_v2 = vadd.f32 %v1366_v62, %v494_v58  ;;  %v666_v3 = vpop.f32.mrb[1].mxu0  ;;  %v698_v4 = vpop.f32.mrb[1].mxu1 }
 0x208   : > { %v729_v7 = vadd.f32 %v666_v3, %v484_v59  ;;  %v737_v8 = vadd.f32 %v698_v4, %v492_v60  ;;  %v1359_v9 = vpop.f32.mrb[2].mxu0  ;;  %v1367_v10 = vpop.f32.mrb[2].mxu1 }
 0x209   : > { %747 = vst [vmem:[#allocation3 + $0x10] sm:$0xff] %v731_v1  ;;  %755 = vst [vmem:[#allocation3 + $0x50] sm:$0xff] %v739_v2  ;;  %v732_v11 = vadd.f32 %v1359_v9, %v487_v63  ;;  %v740_v12 = vadd.f32 %v1367_v10, %v495_v0  ;;  %v669_v13 = vpop.f32.mrb[3].mxu0  ;;  %v701_v14 = vpop.f32.mrb[3].mxu1 }
 0x20a   : > { %745 = vst [vmem:[#allocation3] sm:$0xff] %v729_v7  ;;  %753 = vst [vmem:[#allocation3 + $0x40] sm:$0xff] %v737_v8  ;;  %v730_v15 = vadd.f32 %v669_v13, %v485_v5  ;;  %v738_v16 = vadd.f32 %v701_v14, %v493_v6 }
 0x20b   : > { %748 = vst [vmem:[#allocation3 + $0x18] sm:$0xff] %v732_v11  ;;  %756 = vst [vmem:[#allocation3 + $0x58] sm:$0xff] %v740_v12 }
 0x20c   : > { %746 = vst [vmem:[#allocation3 + $0x8] sm:$0xff] %v730_v15  ;;  %754 = vst [vmem:[#allocation3 + $0x48] sm:$0xff] %v738_v16 }
 0x20e   : > { %v1362_v21 = vpop.f32.mrb[4].mxu0  ;;  %v1370_v22 = vpop.f32.mrb[4].mxu1 }
 0x20f   : > { %v735_v25 = vadd.f32 %v1362_v21, %v490_v17  ;;  %v743_v26 = vadd.f32 %v1370_v22, %v498_v18  ;;  %v682_v27 = vpop.f32.mrb[5].mxu0  ;;  %v714_v28 = vpop.f32.mrb[5].mxu1 }
 0x210   : > { %v733_v31 = vadd.f32 %v682_v27, %v488_v19  ;;  %v741_v32 = vadd.f32 %v714_v28, %v496_v20  ;;  %v1363_v33 = vpop.f32.mrb[6].mxu0  ;;  %v1371_v34 = vpop.f32.mrb[6].mxu1 }
 0x211   : > { %751 = vst [vmem:[#allocation3 + $0x30] sm:$0xff] %v735_v25  ;;  %759 = vst [vmem:[#allocation3 + $0x70] sm:$0xff] %v743_v26  ;;  %v736_v35 = vadd.f32 %v1363_v33, %v491_v23  ;;  %v744_v36 = vadd.f32 %v1371_v34, %v499_v24  ;;  %v685_v37 = vpop.f32.mrb[7].mxu0  ;;  %v717_v38 = vpop.f32.mrb[7].mxu1 }
 0x212   : > { %749 = vst [vmem:[#allocation3 + $0x20] sm:$0xff] %v733_v31  ;;  %757 = vst [vmem:[#allocation3 + $0x60] sm:$0xff] %v741_v32  ;;  %v734_v39 = vadd.f32 %v685_v37, %v489_v29  ;;  %v742_v40 = vadd.f32 %v717_v38, %v497_v30 }
 0x213   : > { %752 = vst [vmem:[#allocation3 + $0x38] sm:$0xff] %v736_v35  ;;  %760 = vst [vmem:[#allocation3 + $0x78] sm:$0xff] %v744_v36 }
 0x214   : > { %750 = vst [vmem:[#allocation3 + $0x28] sm:$0xff] %v734_v39  ;;  %758 = vst [vmem:[#allocation3 + $0x68] sm:$0xff] %v742_v40 }
 0x215 PF: > { %p1240_p7 = scmp.ne.s32.totalorder %s1523_s18, 1 }
 0x216   : > { %v800_v41 = vld [vmem:[#allocation2] sm:$0xff] (!%p1240_p7)  ;;  %v801_v42 = vld [vmem:[#allocation2 + $0x8] sm:$0xff] (!%p1240_p7)  ;;  %v802_v43 = vld [vmem:[#allocation2 + $0x10] sm:$0xff] (!%p1240_p7) }
 0x217   : > { %763 = sbr.rel (%p1240_p7) target bundleno = 793 (0x319), region = 56  ;;  %1372 = vmatprep.subr.bf16.mxu0 (!%p1240_p7), %v800_v41  ;;  %1436 = vmatprep.subr.bf16.mxu1 (!%p1240_p7), %v800_v41  ;;  %v1501_v44 = vld [vmem:[%s1753_s0] sm:$0xff] (!%p1240_p7)   ;;  %v803_v46 = vld [vmem:[#allocation2 + $0x18] sm:$0xff] (!%p1240_p7)  ;;  %v804_v47 = vld [vmem:[#allocation2 + $0x20] sm:$0xff] (!%p1240_p7) }
 0x218   : > { %1373 = vmatpush3.bf16.msra.mxu0 (!%p1240_p7), %v800_v41  ;;  %1444 = vmatpush3.bf16.msra.mxu1 (!%p1240_p7), %v800_v41  ;;  %v1502_v45 = vld [vmem:[%s1753_s0 + $0x20] sm:$0xff] (!%p1240_p7)   ;;  %v805_v48 = vld [vmem:[#allocation2 + $0x28] sm:$0xff] (!%p1240_p7)  ;;  %v807_v50 = vld [vmem:[#allocation2 + $0x38] sm:$0xff] (!%p1240_p7) }
 0x219   : > { %1374 = vmatprep.subr.bf16.mxu0 (!%p1240_p7), %v801_v42  ;;  %1437 = vmatprep.subr.bf16.mxu1 (!%p1240_p7), %v801_v42  ;;  %v806_v49 = vld [vmem:[#allocation2 + $0x30] sm:$0xff] (!%p1240_p7)  ;;  %v1503_v51 = vld [vmem:[%s1753_s0 + $0x8] sm:$0xff] (!%p1240_p7)   ;;  %v1505_v53 = vld [vmem:[%s1753_s0 + $0x10] sm:$0xff] (!%p1240_p7)  }
 0x21a   : > { %1388 = vmatprep.mubr.bf16.mxu0 (!%p1240_p7), %v1501_v44  ;;  %1396 = vmatprep.mubr.bf16.mxu1 (!%p1240_p7), %v1502_v45  ;;  %v1504_v52 = vld [vmem:[%s1753_s0 + $0x28] sm:$0xff] (!%p1240_p7)   ;;  %v1506_v54 = vld [vmem:[%s1753_s0 + $0x30] sm:$0xff] (!%p1240_p7)   ;;  %v1507_v55 = vld [vmem:[%s1753_s0 + $0x18] sm:$0xff] (!%p1240_p7)  }
 0x21b   : > { %v1508_v56 = vld [vmem:[%s1753_s0 + $0x38] sm:$0xff] (!%p1240_p7)   ;;  %v766_v57 = vld [vmem:[#allocation3 + $0x10] sm:$0xff] (!%p1240_p7)  ;;  %v764_v59 = vld [vmem:[#allocation3] sm:$0xff] (!%p1240_p7) }
 0x21c   : > { %1375 = vmatpush3.bf16.msra.mxu0 (!%p1240_p7), %v801_v42  ;;  %1445 = vmatpush3.bf16.msra.mxu1 (!%p1240_p7), %v801_v42  ;;  %v774_v58 = vld [vmem:[#allocation3 + $0x50] sm:$0xff] (!%p1240_p7)  ;;  %v772_v60 = vld [vmem:[#allocation3 + $0x40] sm:$0xff] (!%p1240_p7)  ;;  %v767_v63 = vld [vmem:[#allocation3 + $0x18] sm:$0xff] (!%p1240_p7) }
 0x21d   : > { %1376 = vmatprep.subr.bf16.mxu0 (!%p1240_p7), %v802_v43  ;;  %1438 = vmatprep.subr.bf16.mxu1 (!%p1240_p7), %v802_v43  ;;  %v775_v0 = vld [vmem:[#allocation3 + $0x58] sm:$0xff] (!%p1240_p7)  ;;  %v765_v5 = vld [vmem:[#allocation3 + $0x8] sm:$0xff] (!%p1240_p7)  ;;  %v770_v17 = vld [vmem:[#allocation3 + $0x30] sm:$0xff] (!%p1240_p7) }
 0x21e   : > { %v773_v6 = vld [vmem:[#allocation3 + $0x48] sm:$0xff]  ;;  %v778_v18 = vld [vmem:[#allocation3 + $0x70] sm:$0xff]  ;;  %v768_v19 = vld [vmem:[#allocation3 + $0x20] sm:$0xff] }
 0x21f   : > { %v776_v20 = vld [vmem:[#allocation3 + $0x60] sm:$0xff]  ;;  %v771_v23 = vld [vmem:[#allocation3 + $0x38] sm:$0xff]  ;;  %v769_v29 = vld [vmem:[#allocation3 + $0x28] sm:$0xff] }
 0x220   : > { %1377 = vmatpush3.bf16.msra.mxu0 %v802_v43  ;;  %1446 = vmatpush3.bf16.msra.mxu1 %v802_v43  ;;  %v779_v24 = vld [vmem:[#allocation3 + $0x78] sm:$0xff]  ;;  %v777_v30 = vld [vmem:[#allocation3 + $0x68] sm:$0xff] }
 0x221   : > { %1378 = vmatprep.subr.bf16.mxu0 %v803_v46  ;;  %1439 = vmatprep.subr.bf16.mxu1 %v803_v46 }
 0x224   : > { %1379 = vmatpush3.bf16.msra.mxu0 %v803_v46  ;;  %1447 = vmatpush3.bf16.msra.mxu1 %v803_v46 }
 0x225   : > { %1380 = vmatprep.subr.bf16.mxu0 %v804_v47  ;;  %1440 = vmatprep.subr.bf16.mxu1 %v804_v47 }
 0x228   : > { %1381 = vmatpush3.bf16.msra.mxu0 %v804_v47  ;;  %1448 = vmatpush3.bf16.msra.mxu1 %v804_v47 }
 0x229   : > { %1382 = vmatprep.subr.bf16.mxu0 %v805_v48  ;;  %1441 = vmatprep.subr.bf16.mxu1 %v805_v48 }
 0x22c   : > { %1383 = vmatpush3.bf16.msra.mxu0 %v805_v48  ;;  %1449 = vmatpush3.bf16.msra.mxu1 %v805_v48 }
 0x22d   : > { %1384 = vmatprep.subr.bf16.mxu0 %v806_v49  ;;  %1442 = vmatprep.subr.bf16.mxu1 %v806_v49 }
 0x230   : > { %1385 = vmatpush3.bf16.msra.mxu0 %v806_v49  ;;  %1450 = vmatpush3.bf16.msra.mxu1 %v806_v49 }
 0x231   : > { %1386 = vmatprep.subr.bf16.mxu0 %v807_v50  ;;  %1443 = vmatprep.subr.bf16.mxu1 %v807_v50 }
 0x234   : > { %1387 = vmatpush3.bf16.msra.mxu0 %v807_v50  ;;  %1451 = vmatpush3.bf16.msra.mxu1 %v807_v50 }
 0x237   : > { %1389 = vmatmul.mubr.bf16.vlgmr.msra.gmra.mrb[0].mxu0 %v1503_v51  ;;  %1397 = vmatmul.mubr.bf16.vlgmr.msra.gmra.mrb[0].mxu1 %v1504_v52 }
 0x238   : > { %1392 = vmatprep.mubr.bf16.mxu0 %v1505_v53  ;;  %1400 = vmatprep.mubr.bf16.mxu1 %v1506_v54 }
 0x23f   : > { %1393 = vmatmul.mubr.bf16.gmra.mrb[4].mxu0 %v1507_v55  ;;  %1401 = vmatmul.mubr.bf16.gmra.mrb[4].mxu1 %v1508_v56 }
 0x30a   : > { %v1390_v61 = vpop.f32.mrb[0].mxu0  ;;  %v1398_v62 = vpop.f32.mrb[0].mxu1 }
 0x30b   : > { %v955_v1 = vadd.f32 %v1390_v61, %v766_v57  ;;  %v963_v2 = vadd.f32 %v1398_v62, %v774_v58  ;;  %v890_v3 = vpop.f32.mrb[1].mxu0  ;;  %v922_v4 = vpop.f32.mrb[1].mxu1 }
 0x30c   : > { %v953_v7 = vadd.f32 %v890_v3, %v764_v59  ;;  %v961_v8 = vadd.f32 %v922_v4, %v772_v60  ;;  %v1391_v9 = vpop.f32.mrb[2].mxu0  ;;  %v1399_v10 = vpop.f32.mrb[2].mxu1 }
 0x30d   : > { %971 = vst [vmem:[#allocation3 + $0x10] sm:$0xff] %v955_v1  ;;  %979 = vst [vmem:[#allocation3 + $0x50] sm:$0xff] %v963_v2  ;;  %v956_v11 = vadd.f32 %v1391_v9, %v767_v63  ;;  %v964_v12 = vadd.f32 %v1399_v10, %v775_v0  ;;  %v893_v13 = vpop.f32.mrb[3].mxu0  ;;  %v925_v14 = vpop.f32.mrb[3].mxu1 }
 0x30e   : > { %969 = vst [vmem:[#allocation3] sm:$0xff] %v953_v7  ;;  %977 = vst [vmem:[#allocation3 + $0x40] sm:$0xff] %v961_v8  ;;  %v954_v15 = vadd.f32 %v893_v13, %v765_v5  ;;  %v962_v16 = vadd.f32 %v925_v14, %v773_v6 }
 0x30f   : > { %972 = vst [vmem:[#allocation3 + $0x18] sm:$0xff] %v956_v11  ;;  %980 = vst [vmem:[#allocation3 + $0x58] sm:$0xff] %v964_v12 }
 0x310   : > { %970 = vst [vmem:[#allocation3 + $0x8] sm:$0xff] %v954_v15  ;;  %978 = vst [vmem:[#allocation3 + $0x48] sm:$0xff] %v962_v16 }
 0x312   : > { %v1394_v21 = vpop.f32.mrb[4].mxu0  ;;  %v1402_v22 = vpop.f32.mrb[4].mxu1 }
 0x313   : > { %v959_v25 = vadd.f32 %v1394_v21, %v770_v17  ;;  %v967_v26 = vadd.f32 %v1402_v22, %v778_v18  ;;  %v906_v27 = vpop.f32.mrb[5].mxu0  ;;  %v938_v28 = vpop.f32.mrb[5].mxu1 }
 0x314   : > { %v957_v31 = vadd.f32 %v906_v27, %v768_v19  ;;  %v965_v32 = vadd.f32 %v938_v28, %v776_v20  ;;  %v1395_v33 = vpop.f32.mrb[6].mxu0  ;;  %v1403_v34 = vpop.f32.mrb[6].mxu1 }
 0x315   : > { %975 = vst [vmem:[#allocation3 + $0x30] sm:$0xff] %v959_v25  ;;  %983 = vst [vmem:[#allocation3 + $0x70] sm:$0xff] %v967_v26  ;;  %v960_v35 = vadd.f32 %v1395_v33, %v771_v23  ;;  %v968_v36 = vadd.f32 %v1403_v34, %v779_v24  ;;  %v909_v37 = vpop.f32.mrb[7].mxu0  ;;  %v941_v38 = vpop.f32.mrb[7].mxu1 }
 0x316   : > { %973 = vst [vmem:[#allocation3 + $0x20] sm:$0xff] %v957_v31  ;;  %981 = vst [vmem:[#allocation3 + $0x60] sm:$0xff] %v965_v32  ;;  %v958_v39 = vadd.f32 %v909_v37, %v769_v29  ;;  %v966_v40 = vadd.f32 %v941_v38, %v777_v30 }
 0x317   : > { %976 = vst [vmem:[#allocation3 + $0x38] sm:$0xff] %v960_v35  ;;  %984 = vst [vmem:[#allocation3 + $0x78] sm:$0xff] %v968_v36 }
 0x318   : > { %974 = vst [vmem:[#allocation3 + $0x28] sm:$0xff] %v958_v39  ;;  %982 = vst [vmem:[#allocation3 + $0x68] sm:$0xff] %v966_v40 }
 0x319 PF: > { %988 = sbr.rel (!%p480_p5) target bundleno = 809 (0x329), region = 60  ;;  %v990_v41 = vld [vmem:[#allocation3] sm:$0xff] (%p480_p5)  ;;  %v991_v42 = vld [vmem:[#allocation3 + $0x8] sm:$0xff] (%p480_p5)  ;;  %v1250_v43 = vld [vmem:[%s1756_s3] ss:$0 sm:$0xff] (%p480_p5) }
 0x31a   : > { %v1013_v44 = vadd.f32 (%p480_p5), %v1250_v43, %v990_v41  ;;  %v1014_v45 = vadd.f32 (%p480_p5), %v1250_v43, %v991_v42  ;;  %v992_v46 = vld [vmem:[#allocation3 + $0x10] sm:$0xff] (%p480_p5)  ;;  %v993_v47 = vld [vmem:[#allocation3 + $0x18] sm:$0xff] (%p480_p5)  ;;  %v998_v59 = vld [vmem:[#allocation3 + $0x40] sm:$0xff] (%p480_p5) }
 0x31b   : > { %v1015_v49 = vadd.f32 (%p480_p5), %v1250_v43, %v992_v46  ;;  %v1016_v50 = vadd.f32 (%p480_p5), %v1250_v43, %v993_v47  ;;  %v999_v60 = vld [vmem:[#allocation3 + $0x48] sm:$0xff] (%p480_p5)  ;;  %v1000_v61 = vld [vmem:[#allocation3 + $0x50] sm:$0xff] (%p480_p5)  ;;  %v1001_v2 = vld [vmem:[#allocation3 + $0x58] sm:$0xff] (%p480_p5)  ;;  %v1021_v7 = vadd.f32 (%p480_p5), %v1250_v43, %v998_v59 }
 0x31c   : > { %v996_v53 = vld [vmem:[#allocation3 + $0x30] sm:$0xff] (%p480_p5)  ;;  %v1029_v55 = vmax.f32 (%p480_p5), %v1013_v44, 0.0  ;;  %v1030_v56 = vmax.f32 (%p480_p5), %v1014_v45, 0.0  ;;  %v1022_v11 = vadd.f32 (%p480_p5), %v1250_v43, %v999_v60  ;;  %v1023_v12 = vadd.f32 (%p480_p5), %v1250_v43, %v1000_v61 }
 0x31d   : > { %v994_v48 = vld [vmem:[#allocation3 + $0x20] sm:$0xff] (%p480_p5)  ;;  %v1019_v58 = vadd.f32 (%p480_p5), %v1250_v43, %v996_v53  ;;  %v1031_v62 = vmax.f32 (%p480_p5), %v1015_v49, 0.0  ;;  %v1032_v63 = vmax.f32 (%p480_p5), %v1016_v50, 0.0  ;;  %v1004_v13 = vld [vmem:[#allocation3 + $0x70] sm:$0xff] (%p480_p5)  ;;  %v1037_v16 = vmax.f32 (%p480_p5), %v1021_v7, 0.0 }
 0x31e   : > { %v1017_v52 = vadd.f32 (%p480_p5), %v1250_v43, %v994_v48  ;;  %v997_v54 = vld [vmem:[#allocation3 + $0x38] sm:$0xff] (%p480_p5)  ;;  %v1002_v3 = vld [vmem:[#allocation3 + $0x60] sm:$0xff] (%p480_p5)  ;;  %v1045_v4 = vpack.c.bf16 (%p480_p5), %v1030_v56, %v1029_v55  ;;  %v1024_v17 = vadd.f32 (%p480_p5), %v1250_v43, %v1001_v2  ;;  %v1038_v20 = vmax.f32 (%p480_p5), %v1022_v11, 0.0 }
 0x31f   : > { %v995_v51 = vld [vmem:[#allocation3 + $0x28] sm:$0xff] (%p480_p5)  ;;  %v1020_v1 = vadd.f32 (%p480_p5), %v1250_v43, %v997_v54  ;;  %v1035_v6 = vmax.f32 (%p480_p5), %v1019_v58, 0.0  ;;  %v1046_v9 = vpack.c.bf16 (%p480_p5), %v1032_v63, %v1031_v62  ;;  %v1005_v14 = vld [vmem:[#allocation3 + $0x78] sm:$0xff] (%p480_p5)  ;;  %v1025_v18 = vadd.f32 (%p480_p5), %v1250_v43, %v1002_v3 }
 0x320   : > { %v1018_v57 = vadd.f32 %v1250_v43, %v995_v51  ;;  %v1033_v0 = vmax.f32 %v1017_v52, 0.0  ;;  %v1003_v8 = vld [vmem:[#allocation3 + $0x68] sm:$0xff]  ;;  %1057 = vst [vmem:[#allocation2] sm:$0xff] %v1045_v4  ;;  %v1039_v21 = vmax.f32 %v1023_v12, 0.0  ;;  %v1040_v23 = vmax.f32 %v1024_v17, 0.0 }
 0x321   : > { %v1036_v10 = vmax.f32 %v1020_v1, 0.0  ;;  %1058 = vst [vmem:[#allocation2 + $0x8] sm:$0xff] %v1046_v9  ;;  %v1026_v22 = vadd.f32 %v1250_v43, %v1003_v8  ;;  %v1041_v24 = vmax.f32 %v1025_v18, 0.0  ;;  %v1027_v25 = vadd.f32 %v1250_v43, %v1004_v13 }
 0x322   : > { %v1034_v5 = vmax.f32 %v1018_v57, 0.0  ;;  %v1028_v26 = vadd.f32 %v1250_v43, %v1005_v14  ;;  %v1049_v27 = vpack.c.bf16 %v1038_v20, %v1037_v16  ;;  %v1050_v29 = vpack.c.bf16 %v1040_v23, %v1039_v21 }
 0x323   : > { %v1048_v19 = vpack.c.bf16 %v1036_v10, %v1035_v6  ;;  %v1042_v28 = vmax.f32 %v1026_v22, 0.0  ;;  %v1043_v30 = vmax.f32 %v1027_v25, 0.0 }
 0x324   : > { %v1047_v15 = vpack.c.bf16 %v1034_v5, %v1033_v0  ;;  %v1044_v31 = vmax.f32 %v1028_v26, 0.0  ;;  %1061 = vst [vmem:[#allocation2 + $0x20] sm:$0xff] %v1049_v27  ;;  %1062 = vst [vmem:[#allocation2 + $0x28] sm:$0xff] %v1050_v29 }
 0x325   : > { %1060 = vst [vmem:[#allocation2 + $0x18] sm:$0xff] %v1048_v19  ;;  %v1051_v32 = vpack.c.bf16 %v1042_v28, %v1041_v24 }
 0x326   : > { %1059 = vst [vmem:[#allocation2 + $0x10] sm:$0xff] %v1047_v15  ;;  %v1052_v33 = vpack.c.bf16 %v1044_v31, %v1043_v30 }
 0x327   : > { %1063 = vst [vmem:[#allocation2 + $0x30] sm:$0xff] %v1051_v32 }
 0x328   : > { %1064 = vst [vmem:[#allocation2 + $0x38] sm:$0xff] %v1052_v33 }
 0x329 PF: > { %1068 = sbr.rel (!%p285_p4) target bundleno = 820 (0x334), region = 64  ;;  %v1069_v34 = vld [vmem:[#allocation3] sm:$0xff] (%p285_p4)  ;;  %v1252_v35 = vld [vmem:[%s1757_s4] ss:$0 sm:$0xff] (%p285_p4)  ;;  %v1070_v36 = vld [vmem:[#allocation3 + $0x8] sm:$0xff] (%p285_p4) }
 0x32a   : > { %v1092_v37 = vadd.f32 (%p285_p4), %v1252_v35, %v1069_v34  ;;  %v1093_v38 = vadd.f32 (%p285_p4), %v1252_v35, %v1070_v36  ;;  %v1071_v39 = vld [vmem:[#allocation3 + $0x10] sm:$0xff] (%p285_p4)  ;;  %v1072_v40 = vld [vmem:[#allocation3 + $0x18] sm:$0xff] (%p285_p4)  ;;  %v1073_v41 = vld [vmem:[#allocation3 + $0x20] sm:$0xff] (%p285_p4) }
 0x32b   : > { %v1094_v42 = vadd.f32 (%p285_p4), %v1252_v35, %v1071_v39  ;;  %v1095_v43 = vadd.f32 (%p285_p4), %v1252_v35, %v1072_v40  ;;  %v1096_v44 = vadd.f32 (%p285_p4), %v1252_v35, %v1073_v41  ;;  %v1074_v45 = vld [vmem:[#allocation3 + $0x28] sm:$0xff] (%p285_p4)  ;;  %v1075_v46 = vld [vmem:[#allocation3 + $0x30] sm:$0xff] (%p285_p4)  ;;  %v1076_v47 = vld [vmem:[#allocation3 + $0x38] sm:$0xff] (%p285_p4) }
 0x32c   : > { %1108 = vst [vmem:[%s1758_s5] sm:$0xff] (%p285_p4), %v1092_v37  ;;  %1109 = vst [vmem:[%s1758_s5 + $0x8] sm:$0xff] (%p285_p4), %v1093_v38  ;;  %v1097_v48 = vadd.f32 (%p285_p4), %v1252_v35, %v1074_v45  ;;  %v1098_v49 = vadd.f32 (%p285_p4), %v1252_v35, %v1075_v46  ;;  %v1099_v50 = vadd.f32 (%p285_p4), %v1252_v35, %v1076_v47  ;;  %v1077_v51 = vld [vmem:[#allocation3 + $0x40] sm:$0xff] (%p285_p4)  ;;  %v1078_v52 = vld [vmem:[#allocation3 + $0x48] sm:$0xff] (%p285_p4) }
 0x32d   : > { %v1079_v53 = vld [vmem:[#allocation3 + $0x50] sm:$0xff] (%p285_p4)  ;;  %1110 = vst [vmem:[%s1758_s5 + $0x10] sm:$0xff] (%p285_p4), %v1094_v42  ;;  %1111 = vst [vmem:[%s1758_s5 + $0x18] sm:$0xff] (%p285_p4), %v1095_v43  ;;  %v1100_v54 = vadd.f32 (%p285_p4), %v1252_v35, %v1077_v51  ;;  %v1101_v55 = vadd.f32 (%p285_p4), %v1252_v35, %v1078_v52  ;;  %v1080_v57 = vld [vmem:[#allocation3 + $0x58] sm:$0xff] (%p285_p4) }
 0x32e   : > { %1112 = vst [vmem:[%s1758_s5 + $0x20] sm:$0xff] (%p285_p4), %v1096_v44  ;;  %v1102_v56 = vadd.f32 (%p285_p4), %v1252_v35, %v1079_v53  ;;  %v1081_v58 = vld [vmem:[#allocation3 + $0x60] sm:$0xff] (%p285_p4)  ;;  %v1082_v59 = vld [vmem:[#allocation3 + $0x68] sm:$0xff] (%p285_p4)  ;;  %1113 = vst [vmem:[%s1758_s5 + $0x28] sm:$0xff] (%p285_p4), %v1097_v48  ;;  %v1103_v60 = vadd.f32 (%p285_p4), %v1252_v35, %v1080_v57 }
 0x32f   : > { %1114 = vst [vmem:[%s1758_s5 + $0x30] sm:$0xff] (%p285_p4), %v1098_v49  ;;  %1115 = vst [vmem:[%s1758_s5 + $0x38] sm:$0xff] (%p285_p4), %v1099_v50  ;;  %v1104_v61 = vadd.f32 (%p285_p4), %v1252_v35, %v1081_v58  ;;  %v1105_v62 = vadd.f32 (%p285_p4), %v1252_v35, %v1082_v59  ;;  %v1083_v63 = vld [vmem:[#allocation3 + $0x70] sm:$0xff] (%p285_p4)  ;;  %v1084_v0 = vld [vmem:[#allocation3 + $0x78] sm:$0xff] (%p285_p4) }
 0x330   : > { %1116 = vst [vmem:[%s1758_s5 + $0x40] sm:$0xff] %v1100_v54  ;;  %1117 = vst [vmem:[%s1758_s5 + $0x48] sm:$0xff] %v1101_v55  ;;  %v1106_v1 = vadd.f32 %v1252_v35, %v1083_v63  ;;  %v1107_v2 = vadd.f32 %v1252_v35, %v1084_v0 }
 0x331   : > { %1118 = vst [vmem:[%s1758_s5 + $0x50] sm:$0xff] %v1102_v56  ;;  %1119 = vst [vmem:[%s1758_s5 + $0x58] sm:$0xff] %v1103_v60 }
 0x332   : > { %1120 = vst [vmem:[%s1758_s5 + $0x60] sm:$0xff] %v1104_v61  ;;  %1121 = vst [vmem:[%s1758_s5 + $0x68] sm:$0xff] %v1105_v62 }
 0x333   : > { %1122 = vst [vmem:[%s1758_s5 + $0x70] sm:$0xff] %v1106_v1  ;;  %1123 = vst [vmem:[%s1758_s5 + $0x78] sm:$0xff] %v1107_v2 }
 0x334 PF: > { %s15_s20 = sadd.s32 1, %s1531_s20   ;;  %s1759_s18 = smov %s1527_s19 }
 0x335   : > { %p12_p8 = scmp.ge.s32.totalorder %s15_s20, 4   ;;  %s1760_s19 = smov %s1762_s21 }
 0x337   :  { %14 = sbr.rel (!%p12_p8) target bundleno = 2 (0x2), region = 98 }

</bundles_post_ra>
